<compile_context>
chip_gen: v7x
topology: tpu7x:2x2x1
jax: 0.10.0
libtpu: 0.0.40
codegen_flags: <defaults>
</compile_context>

<pallas_src>
import jax
import jax.numpy as jnp
from jax.experimental import pallas as pl
from jax.experimental.pallas import tpu as pltpu

_LANE = 128
_TARGET_BLOCK_BYTES = 4 * 1024 * 1024   # ~4 MiB of x per grid step
_VMEM_LIMIT_BYTES = 40 * 1024 * 1024    # fits v5e/v6e (128 MiB) and v7x (64 MiB)


def _dropout2d_kernel(x_ref, scale_ref, o_ref):
    # x_ref:     (TR, TC) tile of the flattened [rows, HW] view
    # scale_ref: (TR, 1)  fp32 per-(sample, channel) scale (0.0 dropped, 1/(1-p) kept)
    # o_ref:     (TR, TC)
    o_ref[...] = (x_ref[...] * scale_ref[...]).astype(o_ref.dtype)


def _round_up(a, m):
    return ((a + m - 1) // m) * m


def dropout2d(x, p, key, training=True):
    """Channel-wise dropout matching hfta Dropout2d.forward.

    x: [N, B, C, H, W].  `p` and `training` must be static Python values
    (use static_argnames under jit); `key` is a jax.random key.
    """
    N, B, C, H, W = x.shape
    if (not training) or p == 0.0:
        return x
    if p >= 1.0:
        # PyTorch Dropout2d with p == 1 zeros everything (avoid 0/0 -> NaN).
        return jnp.zeros_like(x)

    rows = N * B * C
    HW = H * W
    itemsize = jnp.dtype(x.dtype).itemsize
    # Minimum sublane multiple for this dtype (f32: 8, bf16: 16, int8/fp8: 32).
    sub = max(8, 8 * (4 // max(1, itemsize)))

    # Per-(sample, channel) keep mask + scale in fp32 (PyTorch computes the
    # scale factor in fp32 regardless of input dtype).
    keep = jax.random.bernoulli(key, 1.0 - p, shape=(rows, 1))
    scale = keep.astype(jnp.float32) / jnp.float32(1.0 - p)

    # Flatten to [rows, HW]: every row is one (sample, channel) plane.
    # No padding / no post-slice: a last block dim equal to the full extent is
    # always legal; only the tail <128-lane tile uses masked stores.
    x2 = x.reshape(rows, HW)

    # Column tiling: keep the full HW extent unless even a minimum-height
    # block would blow the VMEM budget; then split on 128-lane multiples.
    if HW * itemsize * sub <= 2 * _TARGET_BLOCK_BYTES:
        tc = HW
    else:
        tc = max(_LANE,
                 (_TARGET_BLOCK_BYTES // (sub * itemsize)) // _LANE * _LANE)

    if rows <= sub:
        tr = rows                      # full row extent is always legal
    else:
        tr = max(sub, (_TARGET_BLOCK_BYTES // (tc * itemsize)) // sub * sub)
        # >= 2 row-steps when rows permit: both v7x TensorCores get work;
        # negligible (<= one ~0.35 us step) on single-TC v5e/v6e.
        tr = min(tr, max(sub, _round_up(pl.cdiv(rows, 2), sub)))

    grid = (pl.cdiv(rows, tr), pl.cdiv(HW, tc))

    cost = pl.CostEstimate(
        flops=rows * HW,
        transcendentals=0,
        bytes_accessed=2 * rows * HW * itemsize + rows * 4,
    )

    y2 = pl.pallas_call(
        _dropout2d_kernel,
        out_shape=jax.ShapeDtypeStruct((rows, HW), x.dtype),
        grid_spec=pltpu.PrefetchScalarGridSpec(
            num_scalar_prefetch=0,
            grid=grid,
            in_specs=[
                pl.BlockSpec((tr, tc), lambda i, j: (i, j)),
                pl.BlockSpec((tr, 1), lambda i, j: (i, 0)),
            ],
            out_specs=pl.BlockSpec((tr, tc), lambda i, j: (i, j)),
        ),
        input_output_aliases={0: 0},   # dropout is in-place safe; reuse x2's buffer
        compiler_params=pltpu.CompilerParams(
            dimension_semantics=("parallel", "parallel"),
            vmem_limit_bytes=_VMEM_LIMIT_BYTES,
        ),
        cost_estimate=cost,
    )(x2, scale)

    return y2.reshape(N, B, C, H, W)


if __name__ == "__main__":
    # Small shapes consistent with the module: [N, B, C, H, W]
    N, B, C, H, W = 2, 3, 4, 16, 16
    p = 0.5

    key = jax.random.PRNGKey(0)
    k_x, k_mask = jax.random.split(key)
    x = jax.random.normal(k_x, (N, B, C, H, W), dtype=jnp.float32)

    # jit so the reshape + pallas_call fuse into one executable and the
    # input_output_alias is realized without a defensive copy.
    fn = jax.jit(dropout2d, static_argnames=("p", "training"))

    y = jax.block_until_ready(fn(x, p, k_mask, training=True))
    assert y.shape == x.shape and y.dtype == x.dtype

    # Sanity: each (n, b, c) plane is either all-zero or exactly x / (1 - p).
    y2 = y.reshape(N * B * C, H * W)
    x2 = x.reshape(N * B * C, H * W)
    scaled = x2 / (1.0 - p)
    per_plane_zero = jnp.all(y2 == 0.0, axis=-1)
    per_plane_scaled = jnp.all(jnp.abs(y2 - scaled) < 1e-6, axis=-1)
    assert bool(jnp.all(per_plane_zero | per_plane_scaled))

    # Plane size that is NOT a multiple of 128 (exercises the no-pad,
    # full-extent lane block path with masked tail stores).
    xs = jax.random.normal(k_x, (2, 1, 8, 7, 7), dtype=jnp.float32)
    ys = jax.block_until_ready(fn(xs, p, k_mask, training=True))
    ys2 = ys.reshape(16, 49)
    xs2 = xs.reshape(16, 49)
    ok = jnp.all(ys2 == 0.0, axis=-1) | jnp.all(
        jnp.abs(ys2 - xs2 / (1.0 - p)) < 1e-6, axis=-1)
    assert bool(jnp.all(ok))

    # Eval mode / p=0 pass-through and p=1 all-zero edge cases.
    assert bool(jnp.all(fn(x, p, k_mask, training=False) == x))
    assert bool(jnp.all(fn(x, 0.0, k_mask, training=True) == x))
    assert bool(jnp.all(fn(x, 1.0, k_mask, training=True) == 0.0))

    print("KERNEL_OK")
</pallas_src>

<mosaic_0001>
module attributes {stable_mosaic.version = 11 : i64} {
  func.func @_dropout2d_kernel(%arg0: i32, %arg1: i32, %arg2: memref<16x256xf32, #tpu.memory_space<vmem>>, %arg3: memref<16x1xf32, #tpu.memory_space<vmem>>, %arg4: memref<16x256xf32, #tpu.memory_space<vmem>>) attributes {dimension_semantics = [#tpu.dimension_semantics<parallel>, #tpu.dimension_semantics<parallel>], iteration_bounds = array<i64: 2, 1>, scalar_prefetch = 0 : i64, scratch_operands = 0 : i64, tpu.core_type = #tpu.core_type<tc>, window_params = [{transform_indices = @transform_0, window_bounds = array<i64: 16, 256>}, {transform_indices = @transform_1, window_bounds = array<i64: 16, 1>}, {transform_indices = @transform_2, window_bounds = array<i64: 16, 256>}]} {
    %c0 = arith.constant 0 : index
    %c0_0 = arith.constant 0 : index
    %0 = vector.load %arg2[%c0, %c0_0] : memref<16x256xf32, #tpu.memory_space<vmem>>, vector<16x256xf32>
    %c0_1 = arith.constant 0 : index
    %c0_2 = arith.constant 0 : index
    %1 = vector.load %arg3[%c0_1, %c0_2] : memref<16x1xf32, #tpu.memory_space<vmem>>, vector<16x1xf32>
    %2 = vector.broadcast %1 : vector<16x1xf32> to vector<16x256xf32>
    %3 = arith.mulf %0, %2 : vector<16x256xf32>
    %c0_3 = arith.constant 0 : index
    %c0_4 = arith.constant 0 : index
    %4 = vector.load %arg4[%c0_3, %c0_4] : memref<16x256xf32, #tpu.memory_space<vmem>>, vector<16x256xf32>
    tpu.vector_store %arg4[%c0_3, %c0_4], %3 {strides = array<i32>} : memref<16x256xf32, #tpu.memory_space<vmem>>, vector<16x256xf32>,
    return
  }
  func.func @transform_0(%arg0: i32, %arg1: i32) -> (i32, i32) {
    %c0_i32 = arith.constant 0 : i32
    return %arg0, %arg1 : i32, i32
  }
  func.func @transform_1(%arg0: i32, %arg1: i32) -> (i32, i32) {
    %c0_i32 = arith.constant 0 : i32
    %c0_i32_0 = arith.constant 0 : i32
    return %arg0, %c0_i32 : i32, i32
  }
  func.func @transform_2(%arg0: i32, %arg1: i32) -> (i32, i32) {
    %c0_i32 = arith.constant 0 : i32
    return %arg0, %arg1 : i32, i32
  }
}

</mosaic_0001>

<bundles_post_ra>
// kernel: dropout2d.1
= control target key start
LH: loop header
LB: loop body
LE: loop exit
PB: predicated region body
PF: predicated region fallthrough
CT: control target
= control target key end

     0   :  { %s728_s9 = smov 0   ;;  %s730_s10 = smov 0   ;;  %s854_s0 = inlined_call_operand.vmem [shape: f32[24,256], index: 0, kind: input, shape index: {}, may-alias: {0,2}]   ;;  %s855_s1 = inlined_call_operand.vmem [shape: f32[24,1], index: 1, kind: input, shape index: {}]   ;;  %s856_s2 = inlined_call_operand.vmem [shape: f32[24,256], index: 2, kind: output, shape index: {}, may-alias: {0,2}]  }
   0x1   :  { %s732_s11 = smov 0   ;;  %s734_s12 = smov 0  }
   0x2   :  { %s736_s13 = smov 0  }
   0x3 LB: > { %s466_s14 = sadd.s32 4294967295, %s678_s13   ;;  %s24_s15 = sadd.s32 1, %s674_s12  ;;  %s678_s13 = sphi %s736_s13, %s12_s13   ;;  %s674_s12 = sphi %s734_s12, %s864_s12   ;;  %s670_s11 = sphi %s732_s11, %s863_s11   ;;  %s666_s10 = sphi %s730_s10, %s862_s10   ;;  %s662_s9 = sphi %s728_s9, %s861_s9  }
   0x4   : > { %p26_p0 = scmp.ge.s32.totalorder %s24_s15, 2  ;;  %s87_s16 = sadd.s32 1, %s666_s10 }
   0x5   : > { %p97_p1 = scmp.ne.s32.totalorder %s666_s10, %s662_s9  ;;  %p98_p2 = scmp.eq.s32.totalorder %s466_s14, 1 }
   0x6   : > { %s866_s15 = smov (%p26_p0, %s24_s15), 0  ;;  %p470_p4 = scmp.ge.s32.totalorder %s678_s13, 1 }
   0x7   : > { %p760_p3 = por %p98_p2, %p97_p1  ;;  %s82_s18 = ssub.s32 %s674_s12, %s866_s15 }
   0x8   : > { %p164_p5 = scmp.lt.s32.totalorder %s678_s13, 3  ;;  %p85_p6 = scmp.eq.s32.totalorder %s82_s18, 0 }
   0xa   : > { %p165_p7 = pnand %p470_p4, %p164_p5 }
   0xb   : > { %s769_s19 = scalar_select %p85_p6, %s666_s10, %s87_s16  }
   0xc   : > { %168 = sbr.rel (%p165_p7) target bundleno = 208 (0xd0), region = 28  ;;  %s772_s20 = sshll.u32 (!%p165_p7), %s670_s11, 1  ;;  %v712_v0 = vmov (!%p165_p7), 0  }
   0xd   : > { %607 = vset.pattern.permute.xlu0 (!%p165_p7), %v712_v0  ;;  %p211_p8 = scmp.lt.s32.totalorder (!%p165_p7), %s772_s20, 2  ;;  %s201_s27 = sand.u32 (!%p165_p7), 1, %s662_s9  }
   0xe   : > { %s471_s3 = sshll.u32 (!%p165_p7), %s201_s27, 5 }
   0xf   : > { %s783_s4 = scalar_lea.vmem (!%p165_p7), [#allocation2], %s471_s3  }
  0x13   : > { %s212_s21 = scalar_select %p211_p8, %s772_s20, 2 }
  0x14   : > { %s280_s5 = ssub.s32 (%p760_p3), 3, %s772_s20  ;;  %s499_s6 = sshll.u32 (%p760_p3), %s670_s11, 5 }
  0x15   : > { %s476_s22 = sshll.u32 %s212_s21, 3  ;;  %s496_s26 = sshll.u32 %s212_s21, 4 }
  0x16   : > { %s234_s25 = scalar_lea.vmem %s855_s1, %s476_s22  ;;  %s218_s30 = scalar_lea.vmem %s854_s0, %s496_s26 }
  0x17   : > { %v251_v1 = vld [vmem:[%s234_s25] sm:$0xff]  ;;  %v252_v2 = vld [vmem:[%s234_s25 + $0x8] sm:$0xff]  ;;  %v249_v8 = vld [vmem:[%s218_s30 + $0x10] sm:$0xff]  ;;  %p281_p9 = scmp.lt.s32.totalorder (%p760_p3), %s280_s5, 2  ;;  %s796_s9 = scalar_lea.vmem (%p760_p3), %s856_s2, %s499_s6  }
  0x18   : > { %255 = vperm.xlu0 %607, %v251_v1   ;;  %v247_v3 = vld [vmem:[%s218_s30] sm:$0xff]  ;;  %v248_v4 = vld [vmem:[%s218_s30 + $0x8] sm:$0xff]  ;;  %v250_v9 = vld [vmem:[%s218_s30 + $0x18] sm:$0xff] }
  0x1c   : > { %260 = vperm.xlu0 %607, %v252_v2  }
  0x97   : > { %v256_v5 = vpop.permute.xlu0 %255 }
  0x98   : > { %v263_v6 = vmul.f32 %v256_v5, %v247_v3  ;;  %v264_v7 = vmul.f32 %v256_v5, %v248_v4  ;;  %277 = sbr.rel (!%p760_p3) target bundleno = 208 (0xd0), region = 32 }
  0x9a   : > { %267 = vst [vmem:[%s783_s4] sm:$0xff] %v263_v6  ;;  %268 = vst [vmem:[%s783_s4 + $0x8] sm:$0xff] %v264_v7 }
  0x9b   : > { %v261_v10 = vpop.permute.xlu0 %260 }
  0x9c   : > { %v265_v11 = vmul.f32 %v261_v10, %v249_v8  ;;  %v266_v12 = vmul.f32 %v261_v10, %v250_v9 }
  0x9e   : > { %269 = vst [vmem:[%s783_s4 + $0x10] sm:$0xff] %v265_v11  ;;  %270 = vst [vmem:[%s783_s4 + $0x18] sm:$0xff] %v266_v12 }
  0x9f   : > { %s868_s5 = smov (!%p281_p9, %s280_s5), 2 }
  0xa0   : > { %s497_s14 = sshll.u32 %s868_s5, 8 }
  0xa1   : > { %p484_p10 = scmp.eq.s32.totalorder %s497_s14, 0 }
  0xa2   : > { %s802_s16 = sshrl.u32 (!%p484_p10), %s868_s5, 1 }
  0xa3   : > { %292 = sbr.rel (%p484_p10) target bundleno = 208 (0xd0), region = 36  ;;  %p485_p11 = scmp.le.s32.totalorder (!%p484_p10), %s802_s16, 0 }
  0xaa   : > { %408 = sbr.rel (%p485_p11) target bundleno = 187 (0xbb), region = 87  ;;  %s858_s11 = smov (!%p485_p11), %s796_s9 }
  0xab   : > { %s859_s17 = smov (!%p485_p11), %s783_s4  ;;  %s811_s18 = smov (!%p485_p11), 0  }
  0xac   : > { %s692_s20 = smov (!%p485_p11), 0  }
  0xb1 LB: >> { %v305_v13 = vld [vmem:[%s686_s17] sm:$0xff]  ;;  %v307_v14 = vld [vmem:[%s686_s17 + $0x10] sm:$0xff]  ;;  %v309_v15 = vld [vmem:[%s686_s17 + $0x8] sm:$0xff]  ;;  %s313_s21 = sadd.s32 1, %s690_s18  ;;  %s299_s20 = sadd.s32 1, %s694_s20   ;;  %s694_s20 = sphi %s692_s20, %s299_s20   ;;  %s690_s18 = sphi %s811_s18, %s860_s18   ;;  %s686_s17 = sphi %s859_s17, %s318_s17   ;;  %s682_s11 = sphi %s858_s11, %s319_s11  }
  0xb2   : >> { %306 = vst [vmem:[%s682_s11] sm:$0xff] %v305_v13  ;;  %308 = vst [vmem:[%s682_s11 + $0x10] sm:$0xff] %v307_v14  ;;  %v311_v16 = vld [vmem:[%s686_s17 + $0x18] sm:$0xff]  ;;  %p314_p12 = scmp.ge.s32.totalorder %s313_s21, %s802_s16  ;;  %p298_p13 = scmp.ge.s32.totalorder %s299_s20, %s802_s16 }
  0xb3   : >> { %310 = vst [vmem:[%s682_s11 + $0x8] sm:$0xff] %v309_v15  ;;  %312 = vst [vmem:[%s682_s11 + $0x18] sm:$0xff] %v311_v16 }
  0xb4   : >> { %s870_s21 = smov (%p314_p12, %s313_s21), 0  ;;  %301 = sbr.rel (!%p298_p13) target bundleno = 177 (0xb1), region = 93 }
  0xb5   : >> { %s486_s22 = sshll.u32 %s870_s21, 5  ;;  %s860_s18 = smov %s870_s21 }
  0xb6   : >> { %s318_s17 = scalar_lea.vmem %s783_s4, %s486_s22 [#allocation2]   ;;  %s319_s11 = scalar_lea.vmem %s796_s9, %s486_s22  }
  0xbb PF: > { %s827_s23 = sand.u32 1, %s868_s5   ;;  %s500_s24 = sshll.u32 %s802_s16, 5 }
  0xbc   : > { %s831_s25 = scalar_lea.vmem %s783_s4, %s500_s24 [#allocation2]   ;;  %s326_s26 = scalar_lea.vmem %s796_s9, %s500_s24  }
  0xbd   : > { %p491_p0 = scmp.le.s32.totalorder %s827_s23, 0 }
  0xbe   : > { %s696_s27 = smov (!%p491_p0), %s326_s26   ;;  %s700_s28 = smov (!%p491_p0), %s831_s25  }
  0xbf   : > { %422 = sbr.rel (%p491_p0) target bundleno = 208 (0xd0), region = 98  ;;  %s704_s29 = smov (!%p491_p0), 0  }
  0xc0   : > { %s708_s30 = smov (!%p491_p0), 0  }
  0xc6 LB: >> { %v336_v17 = vld [vmem:[%s702_s28] sm:$0xff]  ;;  %v338_v18 = vld [vmem:[%s702_s28 + $0x8] sm:$0xff]  ;;  %s340_s3 = sadd.s32 1, %s706_s29  ;;  %s330_s30 = sadd.s32 1, %s710_s30   ;;  %s710_s30 = sphi %s708_s30, %s330_s30   ;;  %s706_s29 = sphi %s704_s29, %s705_s29   ;;  %s702_s28 = sphi %s700_s28, %s345_s28   ;;  %s698_s27 = sphi %s696_s27, %s346_s27  }
  0xc7   : >> { %337 = vst [vmem:[%s698_s27] sm:$0xff] %v336_v17  ;;  %339 = vst [vmem:[%s698_s27 + $0x8] sm:$0xff] %v338_v18  ;;  %p341_p1 = scmp.ge.s32.totalorder %s340_s3, %s827_s23  ;;  %p329_p2 = scmp.ge.s32.totalorder %s330_s30, %s827_s23 }
  0xc9   : >> { %s872_s3 = smov (%p341_p1, %s340_s3), 0  ;;  %332 = sbr.rel (!%p329_p2) target bundleno = 198 (0xc6), region = 104 }
  0xca   : >> { %s492_s4 = sshll.u32 %s872_s3, 4  ;;  %s705_s29 = smov %s872_s3  }
  0xcb   : >> { %s345_s28 = scalar_lea.vmem %s831_s25, %s492_s4 [#allocation2]   ;;  %s346_s27 = scalar_lea.vmem %s326_s26, %s492_s4  }
  0xd0 PF: > { %s12_s13 = sadd.s32 1, %s678_s13   ;;  %s861_s9 = smov %s666_s10 }
  0xd1   : > { %p9_p3 = scmp.ge.s32.totalorder %s12_s13, 4   ;;  %s862_s10 = smov %s769_s19 }
  0xd2   : > { %s863_s11 = smov %s674_s12  ;;  %s864_s12 = smov %s866_s15 }
  0xd3   :  { %11 = sbr.rel (!%p9_p3) target bundleno = 3 (0x3), region = 115 }

</bundles_post_ra>
